<compile_context>
chip_gen: v6e
topology: v6e:2x2x1
jax: 0.10.0
libtpu: 0.0.40
codegen_flags: <defaults>
</compile_context>

<pallas_src>
import jax
import jax.numpy as jnp
from jax.experimental import pallas as pl
from jax.experimental.pallas import tpu as pltpu


# ----------------------------------------------------------------------------
# Fused SE kernel: global-avg-pool + FC(ReLU) + FC(Sigmoid) + channel scaling.
# Whole (N*C, H*W) slab processed in a single grid step.
# ----------------------------------------------------------------------------
def _se_kernel(x_ref, w1_ref, w2_ref, o_ref, gate_ref):
    # x_ref   : (N*C, HW)  activations; rows are batch-major (row = n*C + c)
    # w1_ref  : (C_red, C) fc[0].weight (PyTorch Linear layout: (out, in))
    # w2_ref  : (C, C_red) fc[3].weight
    # o_ref   : (N*C, HW)
    # gate_ref: (N*C, 1)   VMEM scratch holding the per-row gate
    NC, HW = x_ref.shape
    w1 = w1_ref[...].astype(jnp.float32)                  # (C_red, C)
    w2 = w2_ref[...].astype(jnp.float32)                  # (C, C_red)
    c_red, C = w1.shape
    N = NC // C

    # One dense, unmasked (8,128)-tiled load of the full slab.
    x = x_ref[...].astype(jnp.float32)                    # (N*C, HW)

    # 1) Global average pool over spatial: cross-lane reduce (XLU).
    pooled = jnp.sum(x, axis=1, keepdims=True) * (1.0 / HW)   # (N*C, 1)

    # 2) Tiny squeeze/excite FCs per batch element, fully static-unrolled
    #    VPU broadcast-MACs (channel counts of 1-4 would waste the MXU).
    for n in range(N):                                     # static unroll
        p_n = pooled[n * C:(n + 1) * C, :]                 # (C, 1)

        hidden = jnp.zeros((c_red, 1), jnp.float32)
        for i in range(C):                                 # static unroll
            hidden = hidden + w1[:, i:i + 1] * p_n[i:i + 1, :]
        hidden = jnp.maximum(hidden, 0.0)                  # ReLU

        g = jnp.zeros((C, 1), jnp.float32)
        for j in range(c_red):                             # static unroll
            g = g + w2[:, j:j + 1] * hidden[j:j + 1, :]

        # Sigmoid: exp on the EUP + approximate reciprocal on the EUP
        # (keeps the otherwise-idle EUP slot busy; no VALU divide).
        g = pl.reciprocal(1.0 + jnp.exp(-g), approx=True)  # (C, 1)

        gate_ref[n * C:(n + 1) * C, :] = g                 # static-slice store

    # 3) Scale: per-row gate broadcast along the lane (spatial) axis.
    #    One dense, unmasked store of the full slab.
    o_ref[...] = (x * gate_ref[...]).astype(o_ref.dtype)


def se_forward(x_nchw, w1, w2):
    """SE forward (eval mode). x_nchw: (N, C, H, W) float32."""
    N, C, H, W = x_nchw.shape
    HW = H * W
    c_red = w1.shape[0]

    # NCHW -> (N*C, H*W): zero-cost view. For this size that is (8, 256),
    # i.e. full unmasked (8,128) f32 tiles on every load/store.
    x2d = x_nchw.reshape(N * C, HW)

    out2d = pl.pallas_call(
        _se_kernel,
        out_shape=jax.ShapeDtypeStruct((N * C, HW), x_nchw.dtype),
        grid=(1,),                                  # single step: 1 DMA in/out
        in_specs=[
            pl.BlockSpec((N * C, HW), lambda i: (0, 0)),
            pl.BlockSpec((c_red, C), lambda i: (0, 0)),
            pl.BlockSpec((C, c_red), lambda i: (0, 0)),
        ],
        out_specs=pl.BlockSpec((N * C, HW), lambda i: (0, 0)),
        scratch_shapes=[pltpu.VMEM((N * C, 1), jnp.float32)],
        compiler_params=pltpu.CompilerParams(
            dimension_semantics=("arbitrary",)),
    )(x2d, w1, w2)

    return out2d.reshape(N, C, H, W)


if __name__ == "__main__":
    key = jax.random.PRNGKey(0)
    k_x, k_w1, k_w2 = jax.random.split(key, 3)

    N, C, H, W = 2, 4, 16, 16
    REDUCTION = 4
    C_RED = C // REDUCTION  # = 1

    x = jax.random.normal(k_x, (N, C, H, W), jnp.float32)
    # PyTorch Linear weights: (out_features, in_features), bias=False.
    w1 = 0.5 * jax.random.normal(k_w1, (C_RED, C), jnp.float32)   # fc[0]
    w2 = 0.5 * jax.random.normal(k_w2, (C, C_RED), jnp.float32)   # fc[3]

    out = se_forward(x, w1, w2)
    out = jax.block_until_ready(out)

    # Plain-JAX reference (eval-mode semantics, exact sigmoid).
    pooled = jnp.mean(x, axis=(2, 3))                              # (N, C)
    gate = jax.nn.sigmoid(jnp.maximum(pooled @ w1.T, 0.0) @ w2.T)  # (N, C)
    ref = x * gate[:, :, None, None]

    assert out.shape == (N, C, H, W), out.shape
    assert jnp.all(jnp.isfinite(out))
    # Tolerance accommodates the EUP approximate reciprocal in the in-kernel
    # sigmoid (relative error ~1e-4 on the gate).
    assert jnp.allclose(out, ref, atol=2e-3, rtol=2e-3), float(
        jnp.max(jnp.abs(out - ref)))
    print("KERNEL_OK")
</pallas_src>

<mosaic_0001>
module attributes {stable_mosaic.version = 11 : i64} {
  func.func @_se_kernel(%arg0: i32, %arg1: memref<8x256xf32, #tpu.memory_space<vmem>>, %arg2: memref<1x4xf32, #tpu.memory_space<vmem>>, %arg3: memref<4x1xf32, #tpu.memory_space<vmem>>, %arg4: memref<8x256xf32, #tpu.memory_space<vmem>>, %arg5: memref<8x1xf32, #tpu.memory_space<vmem>>) attributes {dimension_semantics = [#tpu.dimension_semantics<arbitrary>], iteration_bounds = array<i64: 1>, scalar_prefetch = 0 : i64, scratch_operands = 1 : i64, tpu.core_type = #tpu.core_type<tc>, window_params = [{pipeline_mode = #tpu.pipeline_mode<synchronous>, transform_indices = @transform_0, window_bounds = array<i64: 8, 256>}, {pipeline_mode = #tpu.pipeline_mode<synchronous>, transform_indices = @transform_1, window_bounds = array<i64: 1, 4>}, {pipeline_mode = #tpu.pipeline_mode<synchronous>, transform_indices = @transform_2, window_bounds = array<i64: 4, 1>}, {pipeline_mode = #tpu.pipeline_mode<synchronous>, transform_indices = @transform_3, window_bounds = array<i64: 8, 256>}]} {
    %c0 = arith.constant 0 : index
    %c0_0 = arith.constant 0 : index
    %0 = vector.load %arg2[%c0, %c0_0] : memref<1x4xf32, #tpu.memory_space<vmem>>, vector<1x4xf32>
    %c0_1 = arith.constant 0 : index
    %c0_2 = arith.constant 0 : index
    %1 = vector.load %arg3[%c0_1, %c0_2] : memref<4x1xf32, #tpu.memory_space<vmem>>, vector<4x1xf32>
    %c0_3 = arith.constant 0 : index
    %c0_4 = arith.constant 0 : index
    %2 = vector.load %arg1[%c0_3, %c0_4] : memref<8x256xf32, #tpu.memory_space<vmem>>, vector<8x256xf32>
    %cst = arith.constant dense<0.000000e+00> : vector<8xf32>
    %3 = vector.multi_reduction <add>, %2, %cst [1] : vector<8x256xf32> to vector<8xf32>
    %4 = vector.shape_cast %3 : vector<8xf32> to vector<8x1xf32>
    %cst_5 = arith.constant 3.906250e-03 : f32
    %5 = vector.broadcast %cst_5 : f32 to vector<8x1xf32>
    %6 = arith.mulf %4, %5 : vector<8x1xf32>
    %7 = vector.extract_strided_slice %6 {offsets = [0, 0], sizes = [4, 1], strides = [1, 1]} : vector<8x1xf32> to vector<4x1xf32>
    %cst_6 = arith.constant 0.000000e+00 : f32
    %8 = vector.broadcast %cst_6 : f32 to vector<1x1xf32>
    %9 = vector.extract_strided_slice %0 {offsets = [0, 0], sizes = [1, 1], strides = [1, 1]} : vector<1x4xf32> to vector<1x1xf32>
    %10 = vector.extract_strided_slice %7 {offsets = [0, 0], sizes = [1, 1], strides = [1, 1]} : vector<4x1xf32> to vector<1x1xf32>
    %11 = arith.mulf %9, %10 : vector<1x1xf32>
    %12 = arith.addf %8, %11 : vector<1x1xf32>
    %13 = vector.extract_strided_slice %0 {offsets = [0, 1], sizes = [1, 1], strides = [1, 1]} : vector<1x4xf32> to vector<1x1xf32>
    %14 = vector.extract_strided_slice %7 {offsets = [1, 0], sizes = [1, 1], strides = [1, 1]} : vector<4x1xf32> to vector<1x1xf32>
    %15 = arith.mulf %13, %14 : vector<1x1xf32>
    %16 = arith.addf %12, %15 : vector<1x1xf32>
    %17 = vector.extract_strided_slice %0 {offsets = [0, 2], sizes = [1, 1], strides = [1, 1]} : vector<1x4xf32> to vector<1x1xf32>
    %18 = vector.extract_strided_slice %7 {offsets = [2, 0], sizes = [1, 1], strides = [1, 1]} : vector<4x1xf32> to vector<1x1xf32>
    %19 = arith.mulf %17, %18 : vector<1x1xf32>
    %20 = arith.addf %16, %19 : vector<1x1xf32>
    %21 = vector.extract_strided_slice %0 {offsets = [0, 3], sizes = [1, 1], strides = [1, 1]} : vector<1x4xf32> to vector<1x1xf32>
    %22 = vector.extract_strided_slice %7 {offsets = [3, 0], sizes = [1, 1], strides = [1, 1]} : vector<4x1xf32> to vector<1x1xf32>
    %23 = arith.mulf %21, %22 : vector<1x1xf32>
    %24 = arith.addf %20, %23 : vector<1x1xf32>
    %cst_7 = arith.constant 0.000000e+00 : f32
    %25 = vector.broadcast %cst_7 : f32 to vector<1x1xf32>
    %26 = arith.maximumf %24, %25 : vector<1x1xf32>
    %cst_8 = arith.constant 0.000000e+00 : f32
    %27 = vector.broadcast %cst_8 : f32 to vector<4x1xf32>
    %28 = vector.broadcast %26 : vector<1x1xf32> to vector<4x1xf32>
    %29 = arith.mulf %1, %28 : vector<4x1xf32>
    %30 = arith.addf %27, %29 : vector<4x1xf32>
    %cst_9 = arith.constant 0.000000e+00 : f32
    %31 = vector.broadcast %cst_9 : f32 to vector<4x1xf32>
    %32 = arith.subf %31, %30 : vector<4x1xf32>
    %33 = math.exp %32 : vector<4x1xf32>
    %cst_10 = arith.constant 1.000000e+00 : f32
    %34 = vector.broadcast %cst_10 : f32 to vector<4x1xf32>
    %35 = arith.addf %34, %33 : vector<4x1xf32>
    %36 = tpu.reciprocal %35 {approx = true} : vector<4x1xf32> -> vector<4x1xf32>
    %c0_11 = arith.constant 0 : index
    %c0_12 = arith.constant 0 : index
    %37 = vector.load %arg5[%c0_11, %c0_12] : memref<8x1xf32, #tpu.memory_space<vmem>>, vector<4x1xf32>
    tpu.vector_store %arg5[%c0_11, %c0_12], %36 {strides = array<i32>} : memref<8x1xf32, #tpu.memory_space<vmem>>, vector<4x1xf32>,
    %38 = vector.extract_strided_slice %6 {offsets = [4, 0], sizes = [4, 1], strides = [1, 1]} : vector<8x1xf32> to vector<4x1xf32>
    %cst_13 = arith.constant 0.000000e+00 : f32
    %39 = vector.broadcast %cst_13 : f32 to vector<1x1xf32>
    %40 = vector.extract_strided_slice %0 {offsets = [0, 0], sizes = [1, 1], strides = [1, 1]} : vector<1x4xf32> to vector<1x1xf32>
    %41 = vector.extract_strided_slice %38 {offsets = [0, 0], sizes = [1, 1], strides = [1, 1]} : vector<4x1xf32> to vector<1x1xf32>
    %42 = arith.mulf %40, %41 : vector<1x1xf32>
    %43 = arith.addf %39, %42 : vector<1x1xf32>
    %44 = vector.extract_strided_slice %0 {offsets = [0, 1], sizes = [1, 1], strides = [1, 1]} : vector<1x4xf32> to vector<1x1xf32>
    %45 = vector.extract_strided_slice %38 {offsets = [1, 0], sizes = [1, 1], strides = [1, 1]} : vector<4x1xf32> to vector<1x1xf32>
    %46 = arith.mulf %44, %45 : vector<1x1xf32>
    %47 = arith.addf %43, %46 : vector<1x1xf32>
    %48 = vector.extract_strided_slice %0 {offsets = [0, 2], sizes = [1, 1], strides = [1, 1]} : vector<1x4xf32> to vector<1x1xf32>
    %49 = vector.extract_strided_slice %38 {offsets = [2, 0], sizes = [1, 1], strides = [1, 1]} : vector<4x1xf32> to vector<1x1xf32>
    %50 = arith.mulf %48, %49 : vector<1x1xf32>
    %51 = arith.addf %47, %50 : vector<1x1xf32>
    %52 = vector.extract_strided_slice %0 {offsets = [0, 3], sizes = [1, 1], strides = [1, 1]} : vector<1x4xf32> to vector<1x1xf32>
    %53 = vector.extract_strided_slice %38 {offsets = [3, 0], sizes = [1, 1], strides = [1, 1]} : vector<4x1xf32> to vector<1x1xf32>
    %54 = arith.mulf %52, %53 : vector<1x1xf32>
    %55 = arith.addf %51, %54 : vector<1x1xf32>
    %cst_14 = arith.constant 0.000000e+00 : f32
    %56 = vector.broadcast %cst_14 : f32 to vector<1x1xf32>
    %57 = arith.maximumf %55, %56 : vector<1x1xf32>
    %cst_15 = arith.constant 0.000000e+00 : f32
    %58 = vector.broadcast %cst_15 : f32 to vector<4x1xf32>
    %59 = vector.broadcast %57 : vector<1x1xf32> to vector<4x1xf32>
    %60 = arith.mulf %1, %59 : vector<4x1xf32>
    %61 = arith.addf %58, %60 : vector<4x1xf32>
    %cst_16 = arith.constant 0.000000e+00 : f32
    %62 = vector.broadcast %cst_16 : f32 to vector<4x1xf32>
    %63 = arith.subf %62, %61 : vector<4x1xf32>
    %64 = math.exp %63 : vector<4x1xf32>
    %cst_17 = arith.constant 1.000000e+00 : f32
    %65 = vector.broadcast %cst_17 : f32 to vector<4x1xf32>
    %66 = arith.addf %65, %64 : vector<4x1xf32>
    %67 = tpu.reciprocal %66 {approx = true} : vector<4x1xf32> -> vector<4x1xf32>
    %c4 = arith.constant 4 : index
    %c0_18 = arith.constant 0 : index
    %68 = vector.load %arg5[%c4, %c0_18] : memref<8x1xf32, #tpu.memory_space<vmem>>, vector<4x1xf32>
    tpu.vector_store %arg5[%c4, %c0_18], %67 {strides = array<i32>} : memref<8x1xf32, #tpu.memory_space<vmem>>, vector<4x1xf32>,
    %c0_19 = arith.constant 0 : index
    %c0_20 = arith.constant 0 : index
    %69 = vector.load %arg5[%c0_19, %c0_20] : memref<8x1xf32, #tpu.memory_space<vmem>>, vector<8x1xf32>
    %70 = vector.broadcast %69 : vector<8x1xf32> to vector<8x256xf32>
    %71 = arith.mulf %2, %70 : vector<8x256xf32>
    %c0_21 = arith.constant 0 : index
    %c0_22 = arith.constant 0 : index
    %72 = vector.load %arg4[%c0_21, %c0_22] : memref<8x256xf32, #tpu.memory_space<vmem>>, vector<8x256xf32>
    tpu.vector_store %arg4[%c0_21, %c0_22], %71 {strides = array<i32>} : memref<8x256xf32, #tpu.memory_space<vmem>>, vector<8x256xf32>,
    return
  }
  func.func @transform_0(%arg0: i32) -> (i32, i32) {
    %c0_i32 = arith.constant 0 : i32
    %c0_i32_0 = arith.constant 0 : i32
    %c0_i32_1 = arith.constant 0 : i32
    return %c0_i32, %c0_i32_0 : i32, i32
  }
  func.func @transform_1(%arg0: i32) -> (i32, i32) {
    %c0_i32 = arith.constant 0 : i32
    %c0_i32_0 = arith.constant 0 : i32
    %c0_i32_1 = arith.constant 0 : i32
    return %c0_i32, %c0_i32_0 : i32, i32
  }
  func.func @transform_2(%arg0: i32) -> (i32, i32) {
    %c0_i32 = arith.constant 0 : i32
    %c0_i32_0 = arith.constant 0 : i32
    %c0_i32_1 = arith.constant 0 : i32
    return %c0_i32, %c0_i32_0 : i32, i32
  }
  func.func @transform_3(%arg0: i32) -> (i32, i32) {
    %c0_i32 = arith.constant 0 : i32
    %c0_i32_0 = arith.constant 0 : i32
    %c0_i32_1 = arith.constant 0 : i32
    return %c0_i32, %c0_i32_0 : i32, i32
  }
}

</mosaic_0001>

<bundles_post_ra>
// kernel: tpu_custom_call.1
= control target key start
LH: loop header
LB: loop body
LE: loop exit
PB: predicated region body
PF: predicated region fallthrough
CT: control target
= control target key end

     0   :  { %8 = vsyncpa [#allocation4], 0  ;;  %s273_s0 = inlined_call_operand.hbm [shape: f32[8,256], index: 0, kind: input, shape index: {}]   ;;  %s274_s1 = inlined_call_operand.vmem [shape: f32[1,4], index: 1, kind: input, shape index: {}]   ;;  %s275_s2 = inlined_call_operand.vmem [shape: f32[4,1], index: 2, kind: input, shape index: {}]   ;;  %s276_s3 = inlined_call_operand.hbm [shape: f32[8,256], index: 3, kind: output, shape index: {}]  }
   0x1   :  { %9 = vsyncpa [#allocation5], 0  ;;  %s227_s12 = smov [#allocation3]  }
   0x2   :  { %s16_s13 = sshll.u32 %s227_s12, 4  ;;  %s17_s13 = int_to_ptr.vmem [resolvable:$true] %s16_s13 }
   0x3   :  { %s191_s14 = scalar_lea.vmem %s17_s13, 256  ;;  %p196_p1 = scmp.lt.s32.totalorder %s17_s13, %s17_s13 }
   0x4   :  { %p192_p0 = scmp.ne.s32.totalorder %s17_s13, %s191_s14  ;;  %p197_p2 = scmp.lt.s32.totalorder %s191_s14, %s191_s14 }
   0x6   :  { %p198_p3 = por %p197_p2, %p196_p1 }
   0x8   :  { %p199_p4 = pnand %p198_p3, %p192_p0 }
   0xa   :  { %202 = shalt.err (!%p199_p4)
}
   0xb   :  { %19 = dma.hbm_to_vmem [thread:$0]  %s273_s0, 256, %s17_s13, [#allocation4]  }
   0xc   :  { %223 = dma.done.wait [#allocation4], 256  }
   0xd   :  { %224 = vsyncadd [#allocation4], 4294967040  ;;  %v256_v0 = vld [vmem:[#allocation3] sm:$0xff]  ;;  %v258_v1 = vld [vmem:[#allocation3 + $0x8] sm:$0xff]  ;;  %v38_v3 = vlaneseq  ;;  %s228_s0 = smov 127   ;;  %s229_s19 = smov 126  }
   0xe   :  { %v31_v2 = vadd.f32 %v258_v1, %v256_v0  ;;  %v27_v10 = vld [vmem:[%s274_s1] sm:$0x1]  ;;  %s230_s1 = smov 125   ;;  %v231_v30 = vmov 0   ;;  %vm85_vm0 = vcmask 3072  }
   0xf   :  { %v39_v4 = vshrl.u32 %v38_v3, 7  ;;  %173 = vset.pattern.permute.xlu1 %v231_v30  ;;  %174 = vset.pattern.permute.xlu0 %v231_v30  ;;  %v28_v43 = vld [vmem:[%s275_s2] sm:$0xf]  ;;  %s232_s2 = smov [#allocation6]  }
  0x10   :  { %32 = vadd.xlane.f32.xlu0 %v31_v2  ;;  %s158_s22 = sshll.u32 %s232_s2, 4  ;;  %s159_s22 = int_to_ptr.vmem [resolvable:$true] %s158_s22 }
  0x11   :  { %v96_v5 = vsub.s32 5, %v39_v4  ;;  %v40_v6 = vsub.s32 1, %v39_v4  ;;  %v89_v8 = vsub.s32 4, %v39_v4  ;;  %v51_v11 = vsub.s32 2, %v39_v4  ;;  %s203_s23 = scalar_lea.vmem %s159_s22, 256  ;;  %p208_p6 = scmp.lt.s32.totalorder %s159_s22, %s159_s22 }
  0x12   :  { %v107_v19 = vsub.s32 6, %v39_v4  ;;  %v62_v23 = vsub.s32 3, %v39_v4  ;;  %v118_v26 = vsub.s32 7, %v39_v4  ;;  %v75_v39 = vsub.s32 0, %v39_v4  ;;  %p204_p5 = scmp.ne.s32.totalorder %s159_s22, %s203_s23  ;;  %p209_p7 = scmp.lt.s32.totalorder %s203_s23, %s203_s23 }
  0x14   :  { %p210_p8 = por %p209_p7, %p208_p6 }
  0x16   :  { %p211_p9 = pnand %p210_p8, %p204_p5 }
  0x99   :  { %v33_v7 = vpop.xlane.xlu0 %32 }
  0x9a   :  { %v34_v9 = vmul.f32 0.00390625, %v33_v7 }
  0x9c   :  { %v97_v12 = vrot.slane %v34_v9, %v96_v5  ;;  %v41_v13 = vrot.slane %v34_v9, %v40_v6  ;;  %v90_v14 = vrot.slane %v34_v9, %v89_v8  ;;  %v35_v15 = vmul.f32 %v34_v9, %v27_v10 }
  0x9d   :  { %v52_v18 = vrot.slane %v34_v9, %v51_v11  ;;  %v108_v22 = vrot.slane %v34_v9, %v107_v19  ;;  %v63_v25 = vrot.slane %v34_v9, %v62_v23  ;;  %v119_v28 = vrot.slane %v34_v9, %v118_v26 }
  0x9e   :  { %v99_v16 = vmul.f32 %v97_v12, %v27_v10  ;;  %v43_v17 = vmul.f32 %v41_v13, %v27_v10  ;;  %v92_v20 = vmul.f32 %v90_v14, %v27_v10 }
  0x9f   :  { %v54_v21 = vmul.f32 %v52_v18, %v27_v10  ;;  %v110_v24 = vmul.f32 %v108_v22, %v27_v10  ;;  %v65_v27 = vmul.f32 %v63_v25, %v27_v10  ;;  %v121_v29 = vmul.f32 %v119_v28, %v27_v10 }
  0xa0   :  { %101 = vrot.lane.b32.xlu1 %v99_v16, %s228_s0  ;;  %45 = vrot.lane.b32.xlu0 %v43_v17, %s228_s0 }
  0xa4   :  { %56 = vrot.lane.b32.xlu1 %v54_v21, %s229_s19 }
  0xa8   :  { %112 = vrot.lane.b32.xlu1 %v110_v24, %s229_s19 }
  0xac   :  { %67 = vrot.lane.b32.xlu1 %v65_v27, %s230_s1 }
  0xb0   :  { %123 = vrot.lane.b32.xlu1 %v121_v29, %s230_s1 }
 0x112   :  { %v102_v31 = vpop.permute.xlu1 %101  ;;  %v46_v33 = vpop.permute.xlu0 %45 }
 0x113   :  { %v48_v35 = vadd.f32 %v46_v33, %v35_v15  ;;  %v104_v38 = vadd.f32 %v102_v31, %v92_v20 }
 0x116   :  { %v57_v32 = vpop.permute.xlu1 %56 }
 0x117   :  { %v59_v36 = vadd.f32 %v57_v32, %v48_v35 }
 0x11a   :  { %v113_v34 = vpop.permute.xlu1 %112 }
 0x11b   :  { %v115_v41 = vadd.f32 %v113_v34, %v104_v38 }
 0x11e   :  { %v68_v37 = vpop.permute.xlu1 %67 }
 0x11f   :  { %v70_v40 = vadd.f32 %v68_v37, %v59_v36 }
 0x121   :  { %v71_v42 = vmax.f32 %v70_v40, 0.0 }
 0x122   :  { %v124_v44 = vpop.permute.xlu1 %123 }
 0x123   :  { %v76_v45 = vrot.slane %v71_v42, %v75_v39  ;;  %v126_v46 = vadd.f32 %v124_v44, %v115_v41 }
 0x125   :  { %v78_v47 = vmul.f32 %v76_v45, %v28_v43  ;;  %v127_v48 = vmax.f32 %v126_v46, 0.0 }
 0x127   :  { %v80_v49 = vsub.f32 0.0, %v78_v47  ;;  %v132_v50 = vrot.slane %v127_v48, %v75_v39 }
 0x129   :  { %v81_v51 = vmul.f32 1.442695, %v80_v49  ;;  %v134_v52 = vmul.f32 %v132_v50, %v28_v43 }
 0x12b   :  { %175 = vpow2.f32 %v81_v51  ;;  %v136_v53 = vsub.f32 0.0, %v134_v52 }
 0x12d   :  { %v137_v54 = vmul.f32 1.442695, %v136_v53 }
 0x12f   :  { %177 = vpow2.f32 %v137_v54 }
 0x138   :  { %v176_v55 = vpop.eup %175 }
 0x139   :  { %v83_v56 = vadd.f32 1.0, %v176_v55 }
 0x13b   :  { %179 = vrcp.f32 %v83_v56 }
 0x13c   :  { %v178_v57 = vpop.eup %177 }
 0x13d   :  { %v139_v58 = vadd.f32 1.0, %v178_v57 }
 0x13f   :  { %181 = vrcp.f32 %v139_v58 }
 0x148   :  { %v180_v59 = vpop.eup %179 }
 0x149   :  { %86 = vst.msk [vmem:[#allocation2] sm:$0xf] %vm85_vm0, %v180_v59 }
 0x14c   :  { %v182_v60 = vpop.eup %181 }
 0x14d   :  { %141 = vst.msk [vmem:[#allocation2 + $0x4] sm:$0xf] %vm85_vm0, %v182_v60 }
 0x154   :  { %v142_v61 = vld [vmem:[#allocation2] sm:$0xff] }
 0x155   :  { %145 = vperm.xlu1 %173, %v142_v61  }
 0x1d0   :  { %v146_v62 = vpop.permute.xlu1 %145 }
 0x1d1   :  { %v148_v63 = vmul.f32 %v146_v62, %v256_v0  ;;  %v149_v2 = vmul.f32 %v146_v62, %v258_v1 }
 0x1d3   :  { %150 = vst [vmem:[#allocation6] sm:$0xff] %v148_v63  ;;  %151 = vst [vmem:[#allocation6 + $0x8] sm:$0xff] %v149_v2 }
 0x1d4   :  { %214 = shalt.err (!%p211_p9)
}
 0x1d5   :  { %161 = dma.vmem_to_hbm [thread:$0]  %s159_s22, 256, %s276_s3, [#allocation5]  }
 0x1d6   :  { %225 = dma.done.wait [#allocation5], 256  }
 0x1d7   :  { %226 = vsyncadd [#allocation5], 4294967040 }
 0x1d8   :  { %165 = vsyncpa [#allocation4], 1 }
 0x1d9   :  { %166 = vsyncpa [#allocation5], 1 }

</bundles_post_ra>
